<compile_context>
chip_gen: v5e
topology: v5e:2x2
jax: 0.10.0
libtpu: 0.0.40
codegen_flags: <defaults>
</compile_context>

<pallas_src>
import functools

import jax
import jax.numpy as jnp
from jax.experimental import pallas as pl
from jax.experimental.pallas import tpu as pltpu


def _pointnet_kernel(num_layers, tile_b, tile_n, n_pts, compute_dtype, *refs):
    """refs = (x, w0, b0, ..., w_{L-1}, b_{L-1}, global_out, point_out, max_scratch)."""
    x_ref = refs[0]
    param_refs = refs[1:1 + 2 * num_layers]
    global_ref = refs[1 + 2 * num_layers]    # (TB, C_last, 1); resident across the N axis
    point_ref = refs[2 + 2 * num_layers]     # (TB, C_first, TN)
    max_ref = refs[3 + 2 * num_layers]       # (TB, C_last, SLAB) f32 running-max scratch

    n_idx = pl.program_id(1)

    # Running-max scratch init on the first points-tile of each batch block.
    # Zero-init is equivalent to -inf because every layer (including the last) ends in
    # ReLU, so activations are >= 0.
    @pl.when(n_idx == 0)
    def _():
        max_ref[...] = jnp.zeros_like(max_ref)

    ragged = (n_pts % tile_n) != 0
    if ragged:
        lane = jax.lax.broadcasted_iota(jnp.int32, (1, tile_n), 1)
        valid = lane < (n_pts - n_idx * tile_n)

    slab = 128 if tile_n % 128 == 0 else tile_n
    n_slabs = tile_n // slab

    for tb in range(tile_b):
        # NCW tile: channels on sublanes, points on the 128-lane axis.
        h = x_ref[tb].astype(compute_dtype)                       # (C_in, TN) bf16
        y = None
        for i in range(num_layers):
            w = param_refs[2 * i][...]                            # (C_out, C_in), bf16
            b = param_refs[2 * i + 1][...]                        # (C_out, 1), f32
            # Conv1d(kernel_size=1) == per-point matmul: MXU, f32 accumulation.
            y = jnp.dot(w, h, preferred_element_type=jnp.float32) + b
            y = jnp.maximum(y, 0.0)                               # ReLU (VPU, f32)
            if i == 0:
                # Layer-0 output == point features; lane-dense NCW store (bf16 default).
                point_ref[tb] = y.astype(point_ref.dtype)
            if i + 1 < num_layers:
                h = y.astype(compute_dtype)

        # Per-tile global-max accumulation: VPU-only elementwise max into a fixed-width
        # scratch; the cross-lane (XLU) reduce + narrow store happen once, at the end.
        if ragged:
            y = jnp.where(valid, y, 0.0)                          # mask the tail tile
        acc = y[:, :slab]
        for s in range(1, n_slabs):
            acc = jnp.maximum(acc, y[:, s * slab:(s + 1) * slab])
        max_ref[tb] = jnp.maximum(max_ref[tb], acc)

    @pl.when(n_idx == pl.num_programs(1) - 1)
    def _():
        for tb in range(tile_b):
            global_ref[tb] = jnp.max(max_ref[tb], axis=1,
                                     keepdims=True).astype(global_ref.dtype)


def _vmem_budget_bytes():
    """(vmem_limit_bytes, tile-state budget) sized per TPU generation."""
    physical = 64 * 1024 * 1024                       # conservative default (v7x per-TC)
    try:
        info = pltpu.get_tpu_info()
        physical = int(getattr(info, "vmem_capacity_bytes", physical)) or physical
    except Exception:
        pass
    vmem_limit = int(physical * 0.75)                 # ~96 MiB v5e/v6e, ~48 MiB v7x
    budget = int(vmem_limit * 0.8)                    # headroom for compiler scratch
    return vmem_limit, budget


def _step_vmem_bytes(tile_b, tile_n, c_in, c_sizes, point_itemsize):
    """Rough per-grid-step resident-VMEM estimate (double-buffered I/O + peak-live acts)."""
    c_first, c_last = c_sizes[0], c_sizes[-1]
    pairs = list(zip([c_in] + list(c_sizes[:-1]), c_sizes))
    x_io = 2 * tile_b * c_in * tile_n * 4                       # f32 input block, 2 bufs
    pf_io = 2 * tile_b * c_first * tile_n * point_itemsize      # point-feature block, 2 bufs
    gl_io = 2 * tile_b * c_last * 4
    params = 2 * sum(co * cp * 2 + co * 4 for cp, co in pairs)  # resident weights/biases
    # peak-live activations: bf16 input + f32 output + bf16 copy for the next layer
    act = tile_b * tile_n * max(2 * cp + 6 * co for cp, co in pairs)
    scratch = tile_b * c_last * min(tile_n, 128) * 4
    return x_io + pf_io + gl_io + params + (act * 3) // 2 + scratch


def _pick_tiles(B, n_pts, c_in, c_sizes, point_itemsize, budget):
    """Largest (tile_b, tile_n) whose per-step state fits the generation-aware budget."""
    if n_pts <= 128:
        tile_n = n_pts                                   # full-N tile (legal block shape)
    else:
        n_pad = ((n_pts + 127) // 128) * 128
        tile_n = 128
        for cand in (8192, 4096, 2048, 1024, 512, 256, 128):
            if cand <= n_pad and _step_vmem_bytes(1, cand, c_in, c_sizes,
                                                  point_itemsize) <= budget:
                tile_n = cand
                break
    tile_b = 1
    for cand in (8, 4, 2):
        if B % cand == 0 and _step_vmem_bytes(cand, tile_n, c_in, c_sizes,
                                              point_itemsize) <= budget:
            tile_b = cand
            break
    return tile_b, tile_n


def pointnet_forward(x_ncw, weights, biases, *, compute_dtype=jnp.bfloat16,
                     point_dtype=None, tile_n=None, tile_b=None):
    """PointNet forward.

    x_ncw:   (B, C_in, N)                 -- PyTorch Conv1d (NCW) layout.
    weights: list of (C_out_i, C_in_i)    -- Conv1d(k=1) weights (kernel dim squeezed).
    biases:  list of (C_out_i,)           -- Conv1d biases.
    Returns (global_features (B, C_last) in x.dtype,
             point_features  (B, C_first, N) in point_dtype (default: compute_dtype)).
    """
    B, c_in, n_pts = x_ncw.shape
    num_layers = len(weights)
    c_sizes = [int(w.shape[0]) for w in weights]
    c_first, c_last = c_sizes[0], c_sizes[-1]
    out_dtype = x_ncw.dtype
    if point_dtype is None:
        # The (B, C_first, N) point-feature writeback is the dominant HBM stream; bf16
        # halves it.  Pass point_dtype=x.dtype if full-precision point features are needed.
        point_dtype = compute_dtype
    point_itemsize = jnp.dtype(point_dtype).itemsize

    # Tiny one-time param prep (weights -> bf16 MXU inputs, biases -> f32 columns).
    # x itself is passed raw: no host-side pad/cast pass over HBM.
    weights_k = [jnp.asarray(w, compute_dtype) for w in weights]
    biases_k = [jnp.asarray(b, jnp.float32).reshape(-1, 1) for b in biases]

    vmem_limit, budget = _vmem_budget_bytes()
    auto_tb, auto_tn = _pick_tiles(B, n_pts, c_in, c_sizes, point_itemsize, budget)
    if tile_n is None:
        tile_n = auto_tn
    if tile_b is None:
        tile_b = auto_tb
    assert tile_n == n_pts or tile_n % 128 == 0, "tile_n must be full-N or a multiple of 128"
    assert B % tile_b == 0, "tile_b must divide the batch"
    grid = (B // tile_b, pl.cdiv(n_pts, tile_n))
    # TODO(synk): on v7x with B // tile_b == 1, split the points axis into a second
    # 'parallel' grid dimension with per-chunk partial maxes to keep both TensorCores busy.

    kernel = functools.partial(_pointnet_kernel, num_layers, tile_b, tile_n, n_pts,
                               compute_dtype)

    in_specs = [pl.BlockSpec((tile_b, c_in, tile_n), lambda b, n: (b, 0, n))]
    flat_params = []
    for w, bias in zip(weights_k, biases_k):
        # Constant-index full blocks: weights / biases stay resident in VMEM.
        in_specs.append(pl.BlockSpec(w.shape, lambda b, n: (0, 0)))
        in_specs.append(pl.BlockSpec(bias.shape, lambda b, n: (0, 0)))
        flat_params.extend([w, bias])

    out_shape = (
        # Global features as a (C_last, 1) column per batch element (sublane-major);
        # the tiny trailing singleton is squeezed host-side.
        jax.ShapeDtypeStruct((B, c_last, 1), out_dtype),
        jax.ShapeDtypeStruct((B, c_first, n_pts), point_dtype),   # point features, NCW
    )
    out_specs = (
        pl.BlockSpec((tile_b, c_last, 1), lambda b, n: (b, 0, 0)),
        pl.BlockSpec((tile_b, c_first, tile_n), lambda b, n: (b, 0, n)),
    )

    scratch_shapes = [
        pltpu.VMEM((tile_b, c_last, 128 if tile_n % 128 == 0 else tile_n), jnp.float32),
    ]

    flops = 2 * B * n_pts * sum(co * cp for cp, co in zip([c_in] + c_sizes[:-1], c_sizes))
    bytes_accessed = (
        int(x_ncw.size) * x_ncw.dtype.itemsize
        + sum(int(w.size) * w.dtype.itemsize for w in weights_k)
        + sum(int(b.size) * 4 for b in biases_k)
        + B * c_last * jnp.dtype(out_dtype).itemsize
        + B * c_first * n_pts * point_itemsize
    )

    global_col, point_feat = pl.pallas_call(
        kernel,
        out_shape=out_shape,
        grid=grid,
        in_specs=in_specs,
        out_specs=out_specs,
        scratch_shapes=scratch_shapes,
        compiler_params=pltpu.CompilerParams(
            dimension_semantics=("parallel", "arbitrary"),
            vmem_limit_bytes=vmem_limit),
        cost_estimate=pl.CostEstimate(
            flops=flops, transcendentals=0, bytes_accessed=bytes_accessed),
    )(x_ncw, *flat_params)

    return global_col[:, :, 0], point_feat


def _reference(x_ncw, weights, biases, matmul_dtype=jnp.float32):
    """Pure-JAX mirror of the PyTorch forward.  With matmul_dtype=bf16 it reproduces the
    kernel's MXU input precision (f32 accumulation, f32 bias/ReLU/max)."""
    h = x_ncw
    point_features = None
    for i, (w, b) in enumerate(zip(weights, biases)):
        y = jnp.einsum("oi,bin->bon",
                       w.astype(matmul_dtype), h.astype(matmul_dtype),
                       preferred_element_type=jnp.float32)
        y = jnp.maximum(y + jnp.asarray(b, jnp.float32).reshape(1, -1, 1), 0.0)
        if i == 0:
            point_features = y
        h = y
    global_features = jnp.max(h, axis=2)
    return global_features, point_features


if __name__ == "__main__":
    # Module config: PointNet(input_features=4, layers=[32, 64]); batch=2, n_pts=16.
    input_features = 4
    layer_sizes = [32, 64]
    B, N = 2, 16

    key = jax.random.PRNGKey(0)
    kx, *kparams = jax.random.split(key, 1 + len(layer_sizes))

    x = jax.random.normal(kx, (B, input_features, N), dtype=jnp.float32)

    weights, biases = [], []
    c_prev = input_features
    for li, c_out in enumerate(layer_sizes):
        kw, kb = jax.random.split(kparams[li])
        scale = 1.0 / jnp.sqrt(jnp.float32(c_prev))
        weights.append(jax.random.uniform(kw, (c_out, c_prev), jnp.float32, -scale, scale))
        biases.append(jax.random.uniform(kb, (c_out,), jnp.float32, -scale, scale))
        c_prev = c_out

    global_feat, point_feat = pointnet_forward(x, weights, biases)
    jax.block_until_ready((global_feat, point_feat))

    assert global_feat.shape == (B, layer_sizes[-1])
    assert point_feat.shape == (B, layer_sizes[0], N)

    point_f32 = point_feat.astype(jnp.float32)

    # Check against a reference with the same bf16 MXU-input rounding (point features
    # additionally carry one bf16 store rounding -> slightly looser tolerance there).
    g_bf, p_bf = _reference(x, weights, biases, matmul_dtype=jnp.bfloat16)
    assert jnp.allclose(global_feat, g_bf, atol=1e-3, rtol=1e-3)
    assert jnp.allclose(point_f32, p_bf, atol=2e-2, rtol=2e-2)

    # Loose check against the full-f32 PyTorch-equivalent reference
    # (difference is only bf16 rounding of MXU inputs / point-feature storage).
    g_32, p_32 = _reference(x, weights, biases, matmul_dtype=jnp.float32)
    assert jnp.allclose(global_feat, g_32, atol=5e-2, rtol=5e-2)
    assert jnp.allclose(point_f32, p_32, atol=5e-2, rtol=5e-2)

    print("KERNEL_OK")
</pallas_src>

<mosaic_0001>
module attributes {stable_mosaic.version = 11 : i64} {
  func.func @_pointnet_kernel(%arg0: i32, %arg1: i32, %arg2: memref<2x4x16xf32, #tpu.memory_space<vmem>>, %arg3: memref<32x4xbf16, #tpu.memory_space<vmem>>, %arg4: memref<32x1xf32, #tpu.memory_space<vmem>>, %arg5: memref<64x32xbf16, #tpu.memory_space<vmem>>, %arg6: memref<64x1xf32, #tpu.memory_space<vmem>>, %arg7: memref<2x64x1xf32, #tpu.memory_space<vmem>>, %arg8: memref<2x32x16xbf16, #tpu.memory_space<vmem>>, %arg9: memref<2x64x16xf32, #tpu.memory_space<vmem>>) attributes {dimension_semantics = [#tpu.dimension_semantics<parallel>, #tpu.dimension_semantics<arbitrary>], iteration_bounds = array<i64: 1, 1>, scalar_prefetch = 0 : i64, scratch_operands = 1 : i64, tpu.core_type = #tpu.core_type<tc>, window_params = [{transform_indices = @transform_0, window_bounds = array<i64: 2, 4, 16>}, {pipeline_mode = #tpu.pipeline_mode<synchronous>, transform_indices = @transform_1, window_bounds = array<i64: 32, 4>}, {pipeline_mode = #tpu.pipeline_mode<synchronous>, transform_indices = @transform_2, window_bounds = array<i64: 32, 1>}, {pipeline_mode = #tpu.pipeline_mode<synchronous>, transform_indices = @transform_3, window_bounds = array<i64: 64, 32>}, {pipeline_mode = #tpu.pipeline_mode<synchronous>, transform_indices = @transform_4, window_bounds = array<i64: 64, 1>}, {transform_indices = @transform_5, window_bounds = array<i64: 2, 64, 1>}, {transform_indices = @transform_6, window_bounds = array<i64: 2, 32, 16>}]} {
    %c0_i32 = arith.constant 0 : i32
    %0 = arith.cmpi eq, %arg1, %c0_i32 : i32
    %1 = arith.extui %0 : i1 to i32
    %c0_i32_0 = arith.constant 0 : i32
    %2 = arith.cmpi ne, %1, %c0_i32_0 : i32
    scf.if %2 {
      %cst_48 = arith.constant 0.000000e+00 : f32
      %62 = vector.broadcast %cst_48 : f32 to vector<2x64x16xf32>
      %c0_49 = arith.constant 0 : index
      %c0_50 = arith.constant 0 : index
      %c0_51 = arith.constant 0 : index
      %63 = vector.load %arg9[%c0_49, %c0_50, %c0_51] : memref<2x64x16xf32, #tpu.memory_space<vmem>>, vector<2x64x16xf32>
      tpu.vector_store %arg9[%c0_49, %c0_50, %c0_51], %62 {strides = array<i32>} : memref<2x64x16xf32, #tpu.memory_space<vmem>>, vector<2x64x16xf32>,
    } else {
    }
    %c0 = arith.constant 0 : index
    %c0_1 = arith.constant 0 : index
    %c0_2 = arith.constant 0 : index
    %3 = vector.load %arg2[%c0, %c0_1, %c0_2] : memref<2x4x16xf32, #tpu.memory_space<vmem>>, vector<1x4x16xf32>
    %4 = vector.shape_cast %3 : vector<1x4x16xf32> to vector<4x16xf32>
    %5 = arith.truncf %4 : vector<4x16xf32> to vector<4x16xbf16>
    %c0_3 = arith.constant 0 : index
    %c0_4 = arith.constant 0 : index
    %6 = vector.load %arg3[%c0_3, %c0_4] : memref<32x4xbf16, #tpu.memory_space<vmem>>, vector<32x4xbf16>
    %c0_5 = arith.constant 0 : index
    %c0_6 = arith.constant 0 : index
    %7 = vector.load %arg4[%c0_5, %c0_6] : memref<32x1xf32, #tpu.memory_space<vmem>>, vector<32x1xf32>
    %cst = arith.constant dense<0.000000e+00> : vector<32x16xf32>
    %8 = tpu.matmul %6, %5, %cst {dimension_numbers = #tpu.dot_dimension_numbers<[1], [0], [0], [1], [0, 0, 1, 1], [], []>} : vector<32x4xbf16>, vector<4x16xbf16>, vector<32x16xf32> -> vector<32x16xf32>
    %9 = vector.broadcast %7 : vector<32x1xf32> to vector<32x16xf32>
    %10 = arith.addf %8, %9 : vector<32x16xf32>
    %cst_7 = arith.constant 0.000000e+00 : f32
    %11 = vector.broadcast %cst_7 : f32 to vector<32x16xf32>
    %12 = arith.maximumf %10, %11 : vector<32x16xf32>
    %13 = arith.truncf %12 : vector<32x16xf32> to vector<32x16xbf16>
    %c0_8 = arith.constant 0 : index
    %c0_9 = arith.constant 0 : index
    %c0_10 = arith.constant 0 : index
    %14 = vector.load %arg8[%c0_8, %c0_9, %c0_10] : memref<2x32x16xbf16, #tpu.memory_space<vmem>>, vector<1x32x16xbf16>
    %15 = vector.shape_cast %14 : vector<1x32x16xbf16> to vector<32x16xbf16>
    %16 = vector.shape_cast %13 : vector<32x16xbf16> to vector<1x32x16xbf16>
    tpu.vector_store %arg8[%c0_8, %c0_9, %c0_10], %16 {strides = array<i32>} : memref<2x32x16xbf16, #tpu.memory_space<vmem>>, vector<1x32x16xbf16>,
    %17 = arith.truncf %12 : vector<32x16xf32> to vector<32x16xbf16>
    %c0_11 = arith.constant 0 : index
    %c0_12 = arith.constant 0 : index
    %18 = vector.load %arg5[%c0_11, %c0_12] : memref<64x32xbf16, #tpu.memory_space<vmem>>, vector<64x32xbf16>
    %c0_13 = arith.constant 0 : index
    %c0_14 = arith.constant 0 : index
    %19 = vector.load %arg6[%c0_13, %c0_14] : memref<64x1xf32, #tpu.memory_space<vmem>>, vector<64x1xf32>
    %cst_15 = arith.constant dense<0.000000e+00> : vector<64x16xf32>
    %20 = tpu.matmul %18, %17, %cst_15 {dimension_numbers = #tpu.dot_dimension_numbers<[1], [0], [0], [1], [0, 0, 1, 1], [], []>} : vector<64x32xbf16>, vector<32x16xbf16>, vector<64x16xf32> -> vector<64x16xf32>
    %21 = vector.broadcast %19 : vector<64x1xf32> to vector<64x16xf32>
    %22 = arith.addf %20, %21 : vector<64x16xf32>
    %cst_16 = arith.constant 0.000000e+00 : f32
    %23 = vector.broadcast %cst_16 : f32 to vector<64x16xf32>
    %24 = arith.maximumf %22, %23 : vector<64x16xf32>
    %c0_17 = arith.constant 0 : index
    %c0_18 = arith.constant 0 : index
    %c0_19 = arith.constant 0 : index
    %25 = vector.load %arg9[%c0_17, %c0_18, %c0_19] : memref<2x64x16xf32, #tpu.memory_space<vmem>>, vector<1x64x16xf32>
    %26 = vector.shape_cast %25 : vector<1x64x16xf32> to vector<64x16xf32>
    %27 = arith.maximumf %26, %24 : vector<64x16xf32>
    %c0_20 = arith.constant 0 : index
    %c0_21 = arith.constant 0 : index
    %c0_22 = arith.constant 0 : index
    %28 = vector.load %arg9[%c0_20, %c0_21, %c0_22] : memref<2x64x16xf32, #tpu.memory_space<vmem>>, vector<1x64x16xf32>
    %29 = vector.shape_cast %28 : vector<1x64x16xf32> to vector<64x16xf32>
    %30 = vector.shape_cast %27 : vector<64x16xf32> to vector<1x64x16xf32>
    tpu.vector_store %arg9[%c0_20, %c0_21, %c0_22], %30 {strides = array<i32>} : memref<2x64x16xf32, #tpu.memory_space<vmem>>, vector<1x64x16xf32>,
    %c1 = arith.constant 1 : index
    %c0_23 = arith.constant 0 : index
    %c0_24 = arith.constant 0 : index
    %31 = vector.load %arg2[%c1, %c0_23, %c0_24] : memref<2x4x16xf32, #tpu.memory_space<vmem>>, vector<1x4x16xf32>
    %32 = vector.shape_cast %31 : vector<1x4x16xf32> to vector<4x16xf32>
    %33 = arith.truncf %32 : vector<4x16xf32> to vector<4x16xbf16>
    %c0_25 = arith.constant 0 : index
    %c0_26 = arith.constant 0 : index
    %34 = vector.load %arg3[%c0_25, %c0_26] : memref<32x4xbf16, #tpu.memory_space<vmem>>, vector<32x4xbf16>
    %c0_27 = arith.constant 0 : index
    %c0_28 = arith.constant 0 : index
    %35 = vector.load %arg4[%c0_27, %c0_28] : memref<32x1xf32, #tpu.memory_space<vmem>>, vector<32x1xf32>
    %cst_29 = arith.constant dense<0.000000e+00> : vector<32x16xf32>
    %36 = tpu.matmul %34, %33, %cst_29 {dimension_numbers = #tpu.dot_dimension_numbers<[1], [0], [0], [1], [0, 0, 1, 1], [], []>} : vector<32x4xbf16>, vector<4x16xbf16>, vector<32x16xf32> -> vector<32x16xf32>
    %37 = vector.broadcast %35 : vector<32x1xf32> to vector<32x16xf32>
    %38 = arith.addf %36, %37 : vector<32x16xf32>
    %cst_30 = arith.constant 0.000000e+00 : f32
    %39 = vector.broadcast %cst_30 : f32 to vector<32x16xf32>
    %40 = arith.maximumf %38, %39 : vector<32x16xf32>
    %41 = arith.truncf %40 : vector<32x16xf32> to vector<32x16xbf16>
    %c1_31 = arith.constant 1 : index
    %c0_32 = arith.constant 0 : index
    %c0_33 = arith.constant 0 : index
    %42 = vector.load %arg8[%c1_31, %c0_32, %c0_33] : memref<2x32x16xbf16, #tpu.memory_space<vmem>>, vector<1x32x16xbf16>
    %43 = vector.shape_cast %42 : vector<1x32x16xbf16> to vector<32x16xbf16>
    %44 = vector.shape_cast %41 : vector<32x16xbf16> to vector<1x32x16xbf16>
    tpu.vector_store %arg8[%c1_31, %c0_32, %c0_33], %44 {strides = array<i32>} : memref<2x32x16xbf16, #tpu.memory_space<vmem>>, vector<1x32x16xbf16>,
    %45 = arith.truncf %40 : vector<32x16xf32> to vector<32x16xbf16>
    %c0_34 = arith.constant 0 : index
    %c0_35 = arith.constant 0 : index
    %46 = vector.load %arg5[%c0_34, %c0_35] : memref<64x32xbf16, #tpu.memory_space<vmem>>, vector<64x32xbf16>
    %c0_36 = arith.constant 0 : index
    %c0_37 = arith.constant 0 : index
    %47 = vector.load %arg6[%c0_36, %c0_37] : memref<64x1xf32, #tpu.memory_space<vmem>>, vector<64x1xf32>
    %cst_38 = arith.constant dense<0.000000e+00> : vector<64x16xf32>
    %48 = tpu.matmul %46, %45, %cst_38 {dimension_numbers = #tpu.dot_dimension_numbers<[1], [0], [0], [1], [0, 0, 1, 1], [], []>} : vector<64x32xbf16>, vector<32x16xbf16>, vector<64x16xf32> -> vector<64x16xf32>
    %49 = vector.broadcast %47 : vector<64x1xf32> to vector<64x16xf32>
    %50 = arith.addf %48, %49 : vector<64x16xf32>
    %cst_39 = arith.constant 0.000000e+00 : f32
    %51 = vector.broadcast %cst_39 : f32 to vector<64x16xf32>
    %52 = arith.maximumf %50, %51 : vector<64x16xf32>
    %c1_40 = arith.constant 1 : index
    %c0_41 = arith.constant 0 : index
    %c0_42 = arith.constant 0 : index
    %53 = vector.load %arg9[%c1_40, %c0_41, %c0_42] : memref<2x64x16xf32, #tpu.memory_space<vmem>>, vector<1x64x16xf32>
    %54 = vector.shape_cast %53 : vector<1x64x16xf32> to vector<64x16xf32>
    %55 = arith.maximumf %54, %52 : vector<64x16xf32>
    %c1_43 = arith.constant 1 : index
    %c0_44 = arith.constant 0 : index
    %c0_45 = arith.constant 0 : index
    %56 = vector.load %arg9[%c1_43, %c0_44, %c0_45] : memref<2x64x16xf32, #tpu.memory_space<vmem>>, vector<1x64x16xf32>
    %57 = vector.shape_cast %56 : vector<1x64x16xf32> to vector<64x16xf32>
    %58 = vector.shape_cast %55 : vector<64x16xf32> to vector<1x64x16xf32>
    tpu.vector_store %arg9[%c1_43, %c0_44, %c0_45], %58 {strides = array<i32>} : memref<2x64x16xf32, #tpu.memory_space<vmem>>, vector<1x64x16xf32>,
    %c0_i32_46 = arith.constant 0 : i32
    %59 = arith.cmpi eq, %arg1, %c0_i32_46 : i32
    %60 = arith.extui %59 : i1 to i32
    %c0_i32_47 = arith.constant 0 : i32
    %61 = arith.cmpi ne, %60, %c0_i32_47 : i32
    scf.if %61 {
      %c0_48 = arith.constant 0 : index
      %c0_49 = arith.constant 0 : index
      %c0_50 = arith.constant 0 : index
      %62 = vector.load %arg9[%c0_48, %c0_49, %c0_50] : memref<2x64x16xf32, #tpu.memory_space<vmem>>, vector<1x64x16xf32>
      %63 = vector.shape_cast %62 : vector<1x64x16xf32> to vector<64x16xf32>
      %cst_51 = arith.constant dense<0xFF800000> : vector<64xf32>
      %64 = vector.multi_reduction <maximumf>, %63, %cst_51 [1] : vector<64x16xf32> to vector<64xf32>
      %65 = vector.shape_cast %64 : vector<64xf32> to vector<64x1xf32>
      %c0_52 = arith.constant 0 : index
      %c0_53 = arith.constant 0 : index
      %c0_54 = arith.constant 0 : index
      %66 = vector.load %arg7[%c0_52, %c0_53, %c0_54] : memref<2x64x1xf32, #tpu.memory_space<vmem>>, vector<1x64x1xf32>
      %67 = vector.shape_cast %66 : vector<1x64x1xf32> to vector<64x1xf32>
      %68 = vector.shape_cast %65 : vector<64x1xf32> to vector<1x64x1xf32>
      tpu.vector_store %arg7[%c0_52, %c0_53, %c0_54], %68 {strides = array<i32>} : memref<2x64x1xf32, #tpu.memory_space<vmem>>, vector<1x64x1xf32>,
      %c1_55 = arith.constant 1 : index
      %c0_56 = arith.constant 0 : index
      %c0_57 = arith.constant 0 : index
      %69 = vector.load %arg9[%c1_55, %c0_56, %c0_57] : memref<2x64x16xf32, #tpu.memory_space<vmem>>, vector<1x64x16xf32>
      %70 = vector.shape_cast %69 : vector<1x64x16xf32> to vector<64x16xf32>
      %cst_58 = arith.constant dense<0xFF800000> : vector<64xf32>
      %71 = vector.multi_reduction <maximumf>, %70, %cst_58 [1] : vector<64x16xf32> to vector<64xf32>
      %72 = vector.shape_cast %71 : vector<64xf32> to vector<64x1xf32>
      %c1_59 = arith.constant 1 : index
      %c0_60 = arith.constant 0 : index
      %c0_61 = arith.constant 0 : index
      %73 = vector.load %arg7[%c1_59, %c0_60, %c0_61] : memref<2x64x1xf32, #tpu.memory_space<vmem>>, vector<1x64x1xf32>
      %74 = vector.shape_cast %73 : vector<1x64x1xf32> to vector<64x1xf32>
      %75 = vector.shape_cast %72 : vector<64x1xf32> to vector<1x64x1xf32>
      tpu.vector_store %arg7[%c1_59, %c0_60, %c0_61], %75 {strides = array<i32>} : memref<2x64x1xf32, #tpu.memory_space<vmem>>, vector<1x64x1xf32>,
    } else {
    }
    return
  }
  func.func @transform_0(%arg0: i32, %arg1: i32) -> (i32, i32, i32) {
    %c0_i32 = arith.constant 0 : i32
    %c0_i32_0 = arith.constant 0 : i32
    return %arg0, %c0_i32, %arg1 : i32, i32, i32
  }
  func.func @transform_1(%arg0: i32, %arg1: i32) -> (i32, i32) {
    %c0_i32 = arith.constant 0 : i32
    %c0_i32_0 = arith.constant 0 : i32
    %c0_i32_1 = arith.constant 0 : i32
    return %c0_i32, %c0_i32_0 : i32, i32
  }
  func.func @transform_2(%arg0: i32, %arg1: i32) -> (i32, i32) {
    %c0_i32 = arith.constant 0 : i32
    %c0_i32_0 = arith.constant 0 : i32
    %c0_i32_1 = arith.constant 0 : i32
    return %c0_i32, %c0_i32_0 : i32, i32
  }
  func.func @transform_3(%arg0: i32, %arg1: i32) -> (i32, i32) {
    %c0_i32 = arith.constant 0 : i32
    %c0_i32_0 = arith.constant 0 : i32
    %c0_i32_1 = arith.constant 0 : i32
    return %c0_i32, %c0_i32_0 : i32, i32
  }
  func.func @transform_4(%arg0: i32, %arg1: i32) -> (i32, i32) {
    %c0_i32 = arith.constant 0 : i32
    %c0_i32_0 = arith.constant 0 : i32
    %c0_i32_1 = arith.constant 0 : i32
    return %c0_i32, %c0_i32_0 : i32, i32
  }
  func.func @transform_5(%arg0: i32, %arg1: i32) -> (i32, i32, i32) {
    %c0_i32 = arith.constant 0 : i32
    %c0_i32_0 = arith.constant 0 : i32
    %c0_i32_1 = arith.constant 0 : i32
    return %arg0, %c0_i32, %c0_i32_0 : i32, i32, i32
  }
  func.func @transform_6(%arg0: i32, %arg1: i32) -> (i32, i32, i32) {
    %c0_i32 = arith.constant 0 : i32
    %c0_i32_0 = arith.constant 0 : i32
    return %arg0, %c0_i32, %arg1 : i32, i32, i32
  }
}

</mosaic_0001>

<bundles_post_ra>
// kernel: tpu_custom_call.1
= control target key start
LH: loop header
LB: loop body
LE: loop exit
PB: predicated region body
PF: predicated region fallthrough
CT: control target
= control target key end

     0   :  { %v721_v0 = vmov 0   ;;  %vm91_vm0 = vcmask 1041408   ;;  %vm84_vm1 = vcmask 31744   ;;  %vm122_vm2 = vcmask 125952   ;;  %s1001_s2 = inlined_call_operand.vmem [shape: f32[32,1], index: 2, kind: input, shape index: {}]   ;;  %s1002_s0 = inlined_call_operand.vmem [shape: f32[2,4,16], index: 0, kind: input, shape index: {}]   ;;  %s1003_s1 = inlined_call_operand.vmem [shape: bf16[32,4], index: 1, kind: input, shape index: {}]   ;;  %s1004_s4 = inlined_call_operand.vmem [shape: f32[64,1], index: 4, kind: input, shape index: {}]   ;;  %s1005_s6 = inlined_call_operand.vmem [shape: bf16[2,32,16], index: 6, kind: output, shape index: {1}]   ;;  %s1006_s3 = inlined_call_operand.vmem [shape: bf16[64,32], index: 3, kind: input, shape index: {}]   ;;  %s1007_s5 = inlined_call_operand.vmem [shape: f32[2,64,1], index: 5, kind: output, shape index: {0}]  }
   0x1   :  { %719 = vset.pattern.permute.xlu1 %v721_v0  ;;  %718 = vset.pattern.permute.xlu0 %v721_v0  ;;  %v299_v1 = vld [vmem:[%s1001_s2 + $0x10] sm:$0xff]  ;;  %v297_v2 = vld [vmem:[%s1001_s2] sm:$0xff]  ;;  %v300_v11 = vld [vmem:[%s1001_s2 + $0x18] sm:$0xff]  ;;  %vm215_vm3 = vcmask 261120   ;;  %vm27_vm4 = vcmask 130048   ;;  %vm569_vm5 = vcmask 7168  }
   0x2   :  { %v44_v3 = vld [vmem:[%s1002_s0] sm:$0xf]  ;;  %313 = vperm.xlu0 %718, %v299_v1   ;;  %303 = vperm.xlu1 %719, %v297_v2   ;;  %v657_v5 = vld [vmem:[%s1002_s0 + $0x4] sm:$0xf]  ;;  %v298_v12 = vld [vmem:[%s1001_s2 + $0x8] sm:$0xff] }
   0x3   :  { %v45_v4 = vpack.c.bf16 %v44_v3, %v44_v3  ;;  %v292_v6 = vpack.c.bf16 %v657_v5, %v657_v5  ;;  %720 = vset.pattern.permute.xlu2 %v721_v0  ;;  %v700_v8 = vld [vmem:[%s1003_s1] sm:$0xff]  ;;  %v701_v14 = vld [vmem:[%s1003_s1 + $0x8] sm:$0xff]  ;;  %v137_v16 = vld [vmem:[%s1004_s4 + $0x10] sm:$0xff] }
   0x4   :  { %66 = vperm.xlu2 %720, %v299_v1   ;;  %v706_v10 = vld [vmem:[%s1003_s1] sm:$0xff]  ;;  %v707_v15 = vld [vmem:[%s1003_s1 + $0x8] sm:$0xff]  ;;  %v138_v18 = vld [vmem:[%s1004_s4 + $0x18] sm:$0xff] }
   0x5   :  { %v93_v7 = vsel %vm91_vm0, %v45_v4, 0  ;;  %v338_v9 = vsel %vm91_vm0, %v292_v6, 0  ;;  %v135_v13 = vld [vmem:[%s1004_s4] sm:$0xff]  ;;  %v136_v17 = vld [vmem:[%s1004_s4 + $0x8] sm:$0xff]  ;;  %v141_v21 = vld [vmem:[%s1004_s4 + $0x30] sm:$0xff] }
   0x6   :  { %102 = vmatpush.bf16.msra.mxu0 %v93_v7  ;;  %347 = vmatpush.bf16.msra.mxu2 %v338_v9  ;;  %v140_v19 = vld [vmem:[%s1004_s4 + $0x28] sm:$0xff]  ;;  %v139_v20 = vld [vmem:[%s1004_s4 + $0x20] sm:$0xff]  ;;  %v142_v22 = vld [vmem:[%s1004_s4 + $0x38] sm:$0xff] }
   0x7   :  { %v702_v7 = vld [vmem:[%s1006_s3] sm:$0xff] }
   0x9   :  { %635 = vmatmul.msk.bf16.vlgmr.msra.gmra.mxu0 %vm84_vm1, %v700_v8  ;;  %666 = vmatmul.msk.bf16.vlgmr.msra.gmra.mxu2 %vm84_vm1, %v706_v10  ;;  %v703_v8 = vld [vmem:[%s1006_s3 + $0x8] sm:$0xff] }
   0xa   :  { %318 = vperm.xlu0 %718, %v300_v11   ;;  %308 = vperm.xlu1 %719, %v298_v12  }
   0xc   :  { %71 = vperm.xlu2 %720, %v300_v11  }
  0x12   :  { %61 = vperm.xlu1 %719, %v298_v12   ;;  %56 = vperm.xlu0 %718, %v297_v2  }
  0x14   :  { %145 = vperm.xlu2 %720, %v135_v13  }
  0x19   :  { %636 = vmatmul.msk.bf16.gmra.mxu0 %vm84_vm1, %v701_v14  ;;  %667 = vmatmul.msk.bf16.gmra.mxu2 %vm84_vm1, %v707_v15  ;;  %v709_v14 = vld [vmem:[%s1006_s3 + $0x8] sm:$0xff]  ;;  %v722_v15 = vmov 0.0  }
  0x1a   :  { %155 = vperm.xlu1 %719, %v137_v16   ;;  %150 = vperm.xlu0 %718, %v136_v17   ;;  %28 = vst.msk [vmem:[#allocation2] sm:$0xff] %vm27_vm4, %v722_v15 }
  0x1b   :  { %29 = vst.msk [vmem:[#allocation2 + $0x8] sm:$0xff] %vm27_vm4, %v722_v15 }
  0x1c   :  { %160 = vperm.xlu2 %720, %v138_v18   ;;  %30 = vst.msk [vmem:[#allocation2 + $0x10] sm:$0xff] %vm27_vm4, %v722_v15 }
  0x1d   :  { %31 = vst.msk [vmem:[#allocation2 + $0x18] sm:$0xff] %vm27_vm4, %v722_v15 }
  0x1e   :  { %32 = vst.msk [vmem:[#allocation2 + $0x20] sm:$0xff] %vm27_vm4, %v722_v15 }
  0x1f   :  { %33 = vst.msk [vmem:[#allocation2 + $0x28] sm:$0xff] %vm27_vm4, %v722_v15 }
  0x20   :  { %34 = vst.msk [vmem:[#allocation2 + $0x30] sm:$0xff] %vm27_vm4, %v722_v15 }
  0x21   :  { %35 = vst.msk [vmem:[#allocation2 + $0x38] sm:$0xff] %vm27_vm4, %v722_v15 }
  0x22   :  { %170 = vperm.xlu1 %719, %v140_v19   ;;  %165 = vperm.xlu0 %718, %v139_v20   ;;  %36 = vst.msk [vmem:[#allocation2 + $0x40] sm:$0xff] %vm27_vm4, %v722_v15 }
  0x23   :  { %37 = vst.msk [vmem:[#allocation2 + $0x48] sm:$0xff] %vm27_vm4, %v722_v15 }
  0x24   :  { %175 = vperm.xlu2 %720, %v141_v21   ;;  %38 = vst.msk [vmem:[#allocation2 + $0x50] sm:$0xff] %vm27_vm4, %v722_v15 }
  0x25   :  { %39 = vst.msk [vmem:[#allocation2 + $0x58] sm:$0xff] %vm27_vm4, %v722_v15 }
  0x26   :  { %40 = vst.msk [vmem:[#allocation2 + $0x60] sm:$0xff] %vm27_vm4, %v722_v15 }
  0x27   :  { %41 = vst.msk [vmem:[#allocation2 + $0x68] sm:$0xff] %vm27_vm4, %v722_v15 }
  0x28   :  { %42 = vst.msk [vmem:[#allocation2 + $0x70] sm:$0xff] %vm27_vm4, %v722_v15 }
  0x29   :  { %43 = vst.msk [vmem:[#allocation2 + $0x78] sm:$0xff] %vm27_vm4, %v722_v15 }
  0x2a   :  { %390 = vperm.xlu1 %719, %v135_v13   ;;  %180 = vperm.xlu0 %718, %v142_v22   ;;  %v708_v13 = vld [vmem:[%s1006_s3] sm:$0xff] }
  0x2c   :  { %395 = vperm.xlu2 %720, %v136_v17   ;;  %v710_v17 = vld [vmem:[%s1006_s3 + $0x10] sm:$0xff] }
  0x32   :  { %405 = vperm.xlu1 %719, %v138_v18   ;;  %400 = vperm.xlu0 %718, %v137_v16   ;;  %v704_v16 = vld [vmem:[%s1006_s3 + $0x10] sm:$0xff]  ;;  %v705_v18 = vld [vmem:[%s1006_s3 + $0x18] sm:$0xff] }
  0x34   :  { %410 = vperm.xlu2 %720, %v139_v20  }
  0x3a   :  { %420 = vperm.xlu1 %719, %v141_v21   ;;  %415 = vperm.xlu0 %718, %v140_v19   ;;  %v711_v19 = vld [vmem:[%s1006_s3 + $0x18] sm:$0xff] }
  0x3c   :  { %425 = vperm.xlu2 %720, %v142_v22  }
  0x5e   :  { %v67_v41 = vpop.permute.xlu2 %66 }
  0x66   :  { %v72_v51 = vpop.permute.xlu2 %71 }
  0x6e   :  { %v146_v21 = vpop.permute.xlu2 %145 }
  0x74   :  { %v314_v23 = vpop.permute.xlu0 %313  ;;  %v304_v24 = vpop.permute.xlu1 %303 }
  0x7c   :  { %v319_v25 = vpop.permute.xlu0 %318  ;;  %v309_v26 = vpop.permute.xlu1 %308 }
  0x84   :  { %v57_v27 = vpop.permute.xlu0 %56  ;;  %v62_v33 = vpop.permute.xlu1 %61 }
  0x86   :  { %v104_v28 = vpop.f32.mrf.mxu0 }
  0x87   :  { %v105_v29 = vadd.f32 %v104_v28, %v57_v27 }
  0x89   :  { %v114_v30 = vmax.f32 %v105_v29, 0.0 }
  0x8b   :  { %v118_v31 = vpack.c.bf16 %v114_v30, %v114_v30 }
  0x8c   :  { %v349_v32 = vpop.f32.mrf.mxu2  ;;  %v151_v20 = vpop.permute.xlu0 %150 }
  0x8d   :  { %123 = vst.msk [vmem:[%s1005_s6] sm:$0xf] %vm122_vm2, %v118_v31  ;;  %v350_v34 = vadd.f32 %v349_v32, %v304_v24  ;;  %v207_v2 = vunpack.c.l.b16 %v118_v31  ;;  %v156_v22 = vpop.permute.xlu1 %155  ;;  %v161_v24 = vpop.permute.xlu2 %160  ;;  %v265_v31 = vld [vmem:[#allocation2] sm:$0xff]  ;;  %v267_v32 = vld [vmem:[#allocation2 + $0x10] sm:$0xff] }
  0x8e   :  { %v106_v35 = vpop.f32.mrf.mxu0 }
  0x8f   :  { %v107_v36 = vadd.f32 %v106_v35, %v62_v33  ;;  %v359_v37 = vmax.f32 %v350_v34, 0.0 }
  0x91   :  { %v115_v38 = vmax.f32 %v107_v36, 0.0  ;;  %v363_v39 = vpack.c.bf16 %v359_v37, %v359_v37 }
  0x93   :  { %v119_v40 = vpack.c.bf16 %v115_v38, %v115_v38  ;;  %668 = vst.msk [vmem:[%s1005_s6 + $0x10] sm:$0xf] %vm122_vm2, %v363_v39  ;;  %v452_v11 = vunpack.c.l.b16 %v363_v39 }
  0x94   :  { %v351_v42 = vpop.f32.mrf.mxu2 }
  0x95   :  { %124 = vst.msk [vmem:[%s1005_s6 + $0x4] sm:$0xf] %vm122_vm2, %v119_v40  ;;  %v352_v43 = vadd.f32 %v351_v42, %v309_v26  ;;  %v208_v0 = vunpack.c.l.b16 %v119_v40  ;;  %v900_v37 = vpop.permute.xlu2 %175 }
  0x96   :  { %v109_v44 = vpop.f32.mrf.mxu0 }
  0x97   :  { %v110_v45 = vadd.f32 %v109_v44, %v67_v41  ;;  %v360_v46 = vmax.f32 %v352_v43, 0.0  ;;  %v211_v4 = vpack.c.b16 %v208_v0, %v207_v2  ;;  %v266_v43 = vld [vmem:[#allocation2 + $0x8] sm:$0xff]  ;;  %v268_v44 = vld [vmem:[#allocation2 + $0x18] sm:$0xff] }
  0x99   :  { %v116_v47 = vmax.f32 %v110_v45, 0.0  ;;  %v364_v48 = vpack.c.bf16 %v360_v46, %v360_v46 }
  0x9b   :  { %v120_v49 = vpack.c.bf16 %v116_v47, %v116_v47  ;;  %669 = vst.msk [vmem:[%s1005_s6 + $0x14] sm:$0xf] %vm122_vm2, %v364_v48  ;;  %v453_v10 = vunpack.c.l.b16 %v364_v48 }
  0x9c   :  { %v354_v50 = vpop.f32.mrf.mxu2 }
  0x9d   :  { %125 = vst.msk [vmem:[%s1005_s6 + $0x8] sm:$0xf] %vm122_vm2, %v120_v49  ;;  %v355_v52 = vadd.f32 %v354_v50, %v314_v23  ;;  %v209_v60 = vunpack.c.l.b16 %v120_v49  ;;  %v456_v12 = vpack.c.b16 %v453_v10, %v452_v11  ;;  %v166_v23 = vpop.permute.xlu0 %165  ;;  %v396_v2 = vpop.permute.xlu2 %395  ;;  %v511_v11 = vld [vmem:[#allocation2 + $0x48] sm:$0xff] }
  0x9e   :  { %v111_v53 = vpop.f32.mrf.mxu0 }
  0x9f   :  { %v112_v54 = vadd.f32 %v111_v53, %v72_v51  ;;  %v361_v55 = vmax.f32 %v355_v52, 0.0 }
  0xa1   :  { %v117_v56 = vmax.f32 %v112_v54, 0.0  ;;  %v365_v57 = vpack.c.bf16 %v361_v55, %v361_v55  ;;  %v510_v54 = vld [vmem:[#allocation2 + $0x40] sm:$0xff]  ;;  %v512_v55 = vld [vmem:[#allocation2 + $0x50] sm:$0xff] }
  0xa3   :  { %v121_v58 = vpack.c.bf16 %v117_v56, %v117_v56  ;;  %670 = vst.msk [vmem:[%s1005_s6 + $0x18] sm:$0xf] %vm122_vm2, %v365_v57  ;;  %v454_v5 = vunpack.c.l.b16 %v365_v57 }
  0xa4   :  { %v356_v59 = vpop.f32.mrf.mxu2 }
  0xa5   :  { %126 = vst.msk [vmem:[%s1005_s6 + $0xc] sm:$0xf] %vm122_vm2, %v121_v58  ;;  %v210_v61 = vunpack.c.l.b16 %v121_v58  ;;  %v357_v62 = vadd.f32 %v356_v59, %v319_v25  ;;  %v896_v25 = vpop.permute.xlu1 %170  ;;  %v898_v28 = vpop.permute.xlu0 %180 }
  0xa7   :  { %v212_v63 = vpack.c.b16 %v210_v61, %v209_v60  ;;  %v362_v1 = vmax.f32 %v357_v62, 0.0 }
  0xa9   :  { %234 = vmatpush.bf16.msrb.mxu0 %v212_v63  ;;  %712 = vmatpush.bf16.msra.mxu1 %v212_v63  ;;  %v366_v3 = vpack.c.bf16 %v362_v1, %v362_v1 }
  0xab   :  { %671 = vst.msk [vmem:[%s1005_s6 + $0x1c] sm:$0xf] %vm122_vm2, %v366_v3  ;;  %v455_v6 = vunpack.c.l.b16 %v366_v3  ;;  %v269_v3 = vld [vmem:[#allocation2 + $0x20] sm:$0xff] }
  0xad   :  { %235 = vmatpush.bf16.msrb.mxu0 %v211_v4  ;;  %713 = vmatpush.bf16.msra.mxu1 %v211_v4  ;;  %v457_v9 = vpack.c.b16 %v455_v6, %v454_v5  ;;  %v391_v40 = vpop.permute.xlu1 %390  ;;  %v401_v45 = vpop.permute.xlu0 %400 }
  0xaf   :  { %478 = vmatpush.bf16.msrb.mxu2 %v457_v9  ;;  %714 = vmatpush.bf16.msra.mxu3 %v457_v9 }
  0xb0   :  { %653 = vmatmul.msk.bf16.vlgmr.msrb.gmra.mxu0 %vm215_vm3, %v702_v7  ;;  %654 = vmatmul.msk.bf16.vlgmr.msra.gmra.mxu1 %vm215_vm3, %v703_v8 }
  0xb3   :  { %479 = vmatpush.bf16.msrb.mxu2 %v456_v12  ;;  %715 = vmatpush.bf16.msra.mxu3 %v456_v12  ;;  %v513_v12 = vld [vmem:[#allocation2 + $0x58] sm:$0xff] }
  0xb5   :  { %v406_v4 = vpop.permute.xlu1 %405 }
  0xb6   :  { %688 = vmatmul.msk.bf16.vlgmr.msrb.gmra.mxu2 %vm215_vm3, %v708_v13  ;;  %689 = vmatmul.msk.bf16.vlgmr.msra.gmra.mxu3 %vm215_vm3, %v709_v14 }
  0xc0   :  { %655 = vmatmul.msk.bf16.gmra.mxu1 %vm215_vm3, %v704_v16 }
  0xc6   :  { %690 = vmatmul.msk.bf16.gmra.mxu3 %vm215_vm3, %v710_v17 }
  0xd0   :  { %656 = vmatmul.msk.bf16.gmra.mxu1 %vm215_vm3, %v705_v18 }
  0xd6   :  { %691 = vmatmul.msk.bf16.gmra.mxu3 %vm215_vm3, %v711_v19 }
 0x12d   :  { %v237_v26 = vpop.f32.mrf.mxu0  ;;  %v242_v27 = vpop.f32.mrf.mxu1 }
 0x12e   :  { %v238_v29 = vadd.f32 %v237_v26, %v146_v21  ;;  %v243_v30 = vadd.f32 %v242_v27, %v156_v22  ;;  %v411_v27 = vpop.permute.xlu2 %410 }
 0x130   :  { %v257_v33 = vmax.f32 %v238_v29, 0.0  ;;  %v259_v34 = vmax.f32 %v243_v30, 0.0 }
 0x132   :  { %v273_v35 = vmax.f32 %v265_v31, %v257_v33  ;;  %v275_v36 = vmax.f32 %v267_v32, %v259_v34  ;;  %v514_v34 = vld [vmem:[#allocation2 + $0x60] sm:$0xff] }
 0x134   :  { %282 = vst.msk [vmem:[#allocation2] sm:$0xff] %vm27_vm4, %v273_v35 }
 0x135   :  { %284 = vst.msk [vmem:[#allocation2 + $0x10] sm:$0xff] %vm27_vm4, %v275_v36  ;;  %v239_v38 = vpop.f32.mrf.mxu0  ;;  %v244_v39 = vpop.f32.mrf.mxu1 }
 0x136   :  { %v240_v41 = vadd.f32 %v239_v38, %v151_v20  ;;  %v245_v42 = vadd.f32 %v244_v39, %v161_v24 }
 0x138   :  { %v258_v46 = vmax.f32 %v240_v41, 0.0  ;;  %v260_v47 = vmax.f32 %v245_v42, 0.0  ;;  %v271_v41 = vld [vmem:[#allocation2 + $0x30] sm:$0xff] }
 0x139   :  { %v481_v48 = vpop.f32.mrf.mxu2  ;;  %v486_v49 = vpop.f32.mrf.mxu3 }
 0x13a   :  { %v274_v50 = vmax.f32 %v266_v43, %v258_v46  ;;  %v276_v51 = vmax.f32 %v268_v44, %v260_v47  ;;  %v482_v52 = vadd.f32 %v481_v48, %v391_v40  ;;  %v487_v53 = vadd.f32 %v486_v49, %v401_v45  ;;  %v416_v45 = vpop.permute.xlu0 %415 }
 0x13b   :  { %v537_v56 = vld [vmem:[#allocation2] sm:$0xff] }
 0x13c   :  { %283 = vst.msk [vmem:[#allocation2 + $0x8] sm:$0xff] %vm27_vm4, %v274_v50  ;;  %v501_v57 = vmax.f32 %v482_v52, 0.0  ;;  %v503_v58 = vmax.f32 %v487_v53, 0.0  ;;  %v539_v59 = vld [vmem:[#allocation2 + $0x10] sm:$0xff]  ;;  %v545_v60 = vsel %vm27_vm4, %v537_v56, -inf  ;;  %v272_v56 = vld [vmem:[#allocation2 + $0x38] sm:$0xff] }
 0x13d   :  { %285 = vst.msk [vmem:[#allocation2 + $0x18] sm:$0xff] %vm27_vm4, %v276_v51  ;;  %v247_v61 = vpop.f32.mrf.mxu1  ;;  %v551_v62 = vsel %vm27_vm4, %v539_v59, -inf  ;;  %546 = vmax.xlane.f32.xlu0 %v545_v60  ;;  %v515_v51 = vld [vmem:[#allocation2 + $0x68] sm:$0xff]  ;;  %v421_v60 = vpop.permute.xlu1 %420 }
 0x13e   :  { %v518_v63 = vmax.f32 %v510_v54, %v501_v57  ;;  %v520_v0 = vmax.f32 %v512_v55, %v503_v58  ;;  %v248_v1 = vadd.f32 %v247_v61, %v166_v23  ;;  %552 = vmax.xlane.f32.xlu2 %v551_v62  ;;  %v270_v23 = vld [vmem:[#allocation2 + $0x28] sm:$0xff] }
 0x140   :  { %526 = vst.msk [vmem:[#allocation2 + $0x40] sm:$0xff] %vm27_vm4, %v518_v63  ;;  %v261_v5 = vmax.f32 %v248_v1, 0.0  ;;  %v516_v1 = vld [vmem:[#allocation2 + $0x70] sm:$0xff] }
 0x141   :  { %528 = vst.msk [vmem:[#allocation2 + $0x50] sm:$0xff] %vm27_vm4, %v520_v0  ;;  %v483_v6 = vpop.f32.mrf.mxu2  ;;  %v488_v7 = vpop.f32.mrf.mxu3 }
 0x142   :  { %v277_v8 = vmax.f32 %v269_v3, %v261_v5  ;;  %v484_v9 = vadd.f32 %v483_v6, %v396_v2  ;;  %v489_v10 = vadd.f32 %v488_v7, %v406_v4  ;;  %v426_v6 = vpop.permute.xlu2 %425 }
 0x143   :  { %v538_v13 = vld [vmem:[#allocation2 + $0x8] sm:$0xff] }
 0x144   :  { %286 = vst.msk [vmem:[#allocation2 + $0x20] sm:$0xff] %vm27_vm4, %v277_v8  ;;  %v502_v14 = vmax.f32 %v484_v9, 0.0  ;;  %v504_v15 = vmax.f32 %v489_v10, 0.0  ;;  %v540_v16 = vld [vmem:[#allocation2 + $0x18] sm:$0xff]  ;;  %v548_v17 = vsel %vm27_vm4, %v538_v13, -inf }
 0x145   :  { %v249_v18 = vpop.f32.mrf.mxu1  ;;  %v554_v19 = vsel %vm27_vm4, %v540_v16, -inf  ;;  %549 = vmax.xlane.f32.xlu1 %v548_v17  ;;  %v517_v9 = vld [vmem:[#allocation2 + $0x78] sm:$0xff] }
 0x146   :  { %v519_v20 = vmax.f32 %v511_v11, %v502_v14  ;;  %v521_v21 = vmax.f32 %v513_v12, %v504_v15  ;;  %v250_v22 = vadd.f32 %v249_v18, %v896_v25  ;;  %555 = vmax.xlane.f32.xlu2 %v554_v19 }
 0x147   :  { %v578_v31 = vld [vmem:[#allocation2 + $0x40] sm:$0xff] }
 0x148   :  { %527 = vst.msk [vmem:[#allocation2 + $0x48] sm:$0xff] %vm27_vm4, %v519_v20  ;;  %v262_v24 = vmax.f32 %v250_v22, 0.0  ;;  %v580_v26 = vld [vmem:[#allocation2 + $0x50] sm:$0xff]  ;;  %v586_v35 = vsel %vm27_vm4, %v578_v31, -inf }
 0x149   :  { %529 = vst.msk [vmem:[#allocation2 + $0x58] sm:$0xff] %vm27_vm4, %v521_v21  ;;  %v491_v29 = vpop.f32.mrf.mxu3  ;;  %v592_v30 = vsel %vm27_vm4, %v580_v26, -inf }
 0x14a   :  { %v278_v32 = vmax.f32 %v270_v23, %v262_v24  ;;  %v492_v33 = vadd.f32 %v491_v29, %v411_v27  ;;  %593 = vmax.xlane.f32.xlu0 %v592_v30 }
 0x14b   :  { %v541_v40 = vld [vmem:[#allocation2 + $0x20] sm:$0xff] }
 0x14c   :  { %287 = vst.msk [vmem:[#allocation2 + $0x28] sm:$0xff] %vm27_vm4, %v278_v32  ;;  %v505_v25 = vmax.f32 %v492_v33, 0.0  ;;  %v557_v47 = vsel %vm27_vm4, %v541_v40, -inf }
 0x14d   :  { %v252_v36 = vpop.f32.mrf.mxu1  ;;  %587 = vmax.xlane.f32.xlu1 %v586_v35 }
 0x14e   :  { %v522_v38 = vmax.f32 %v514_v34, %v505_v25  ;;  %v253_v39 = vadd.f32 %v252_v36, %v900_v37 }
 0x14f   :  { %v579_v42 = vld [vmem:[#allocation2 + $0x48] sm:$0xff] }
 0x150   :  { %530 = vst.msk [vmem:[#allocation2 + $0x60] sm:$0xff] %vm27_vm4, %v522_v38  ;;  %v263_v43 = vmax.f32 %v253_v39, 0.0  ;;  %v589_v44 = vsel %vm27_vm4, %v579_v42, -inf  ;;  %v581_v48 = vld [vmem:[#allocation2 + $0x58] sm:$0xff] }
 0x151   :  { %v493_v46 = vpop.f32.mrf.mxu3  ;;  %590 = vmax.xlane.f32.xlu2 %v589_v44  ;;  %v595_v52 = vsel %vm27_vm4, %v581_v48, -inf }
 0x152   :  { %v279_v49 = vmax.f32 %v271_v41, %v263_v43  ;;  %v494_v50 = vadd.f32 %v493_v46, %v416_v45  ;;  %558 = vmax.xlane.f32.xlu0 %v557_v47 }
 0x153   :  { %v542_v62 = vld [vmem:[#allocation2 + $0x28] sm:$0xff] }
 0x154   :  { %288 = vst.msk [vmem:[#allocation2 + $0x30] sm:$0xff] %vm27_vm4, %v279_v49  ;;  %v506_v37 = vmax.f32 %v494_v50, 0.0  ;;  %v560_v3 = vsel %vm27_vm4, %v542_v62, -inf }
 0x155   :  { %v254_v53 = vpop.f32.mrf.mxu1  ;;  %596 = vmax.xlane.f32.xlu1 %v595_v52 }
 0x156   :  { %v523_v54 = vmax.f32 %v515_v51, %v506_v37  ;;  %v255_v55 = vadd.f32 %v254_v53, %v898_v28 }
 0x157   :  { %v582_v57 = vld [vmem:[#allocation2 + $0x60] sm:$0xff] }
 0x158   :  { %531 = vst.msk [vmem:[#allocation2 + $0x68] sm:$0xff] %vm27_vm4, %v523_v54  ;;  %v264_v58 = vmax.f32 %v255_v55, 0.0  ;;  %v598_v59 = vsel %vm27_vm4, %v582_v57, -inf }
 0x159   :  { %v496_v61 = vpop.f32.mrf.mxu3  ;;  %599 = vmax.xlane.f32.xlu2 %v598_v59 }
 0x15a   :  { %v280_v63 = vmax.f32 %v272_v56, %v264_v58  ;;  %v497_v0 = vadd.f32 %v496_v61, %v421_v60 }
 0x15b   :  { %v543_v28 = vld [vmem:[#allocation2 + $0x30] sm:$0xff] }
 0x15c   :  { %289 = vst.msk [vmem:[#allocation2 + $0x38] sm:$0xff] %vm27_vm4, %v280_v63  ;;  %v507_v2 = vmax.f32 %v497_v0, 0.0  ;;  %v563_v5 = vsel %vm27_vm4, %v543_v28, -inf }
 0x15d   :  { %561 = vmax.xlane.f32.xlu1 %v560_v3 }
 0x15e   :  { %v524_v4 = vmax.f32 %v516_v1, %v507_v2 }
 0x15f   :  { %v583_v16 = vld [vmem:[#allocation2 + $0x68] sm:$0xff] }
 0x160   :  { %532 = vst.msk [vmem:[#allocation2 + $0x70] sm:$0xff] %vm27_vm4, %v524_v4  ;;  %v601_v17 = vsel %vm27_vm4, %v583_v16, -inf }
 0x161   :  { %v498_v7 = vpop.f32.mrf.mxu3  ;;  %564 = vmax.xlane.f32.xlu2 %v563_v5 }
 0x162   :  { %v499_v8 = vadd.f32 %v498_v7, %v426_v6 }
 0x163   :  { %v544_v10 = vld [vmem:[#allocation2 + $0x38] sm:$0xff] }
 0x164   :  { %v508_v11 = vmax.f32 %v499_v8, 0.0  ;;  %v566_v12 = vsel %vm27_vm4, %v544_v10, -inf }
 0x165   :  { %567 = vmax.xlane.f32.xlu0 %v566_v12 }
 0x166   :  { %v525_v13 = vmax.f32 %v517_v9, %v508_v11 }
 0x167   :  { %v584_v14 = vld [vmem:[#allocation2 + $0x70] sm:$0xff] }
 0x168   :  { %533 = vst.msk [vmem:[#allocation2 + $0x78] sm:$0xff] %vm27_vm4, %v525_v13  ;;  %v604_v15 = vsel %vm27_vm4, %v584_v14, -inf }
 0x169   :  { %605 = vmax.xlane.f32.xlu1 %v604_v15 }
 0x16d   :  { %602 = vmax.xlane.f32.xlu0 %v601_v17 }
 0x16f   :  { %v585_v18 = vld [vmem:[#allocation2 + $0x78] sm:$0xff] }
 0x170   :  { %v607_v19 = vsel %vm27_vm4, %v585_v18, -inf }
 0x171   :  { %608 = vmax.xlane.f32.xlu2 %v607_v19 }
 0x1b0   :  { %v547_v20 = vpop.xlane.xlu0 %546 }
 0x1b1   :  { %v553_v21 = vpop.xlane.xlu2 %552  ;;  %570 = vst.msk [vmem:[%s1007_s5] sm:$0xff] %vm569_vm5, %v547_v20 }
 0x1b2   :  { %572 = vst.msk [vmem:[%s1007_s5 + $0x10] sm:$0xff] %vm569_vm5, %v553_v21 }
 0x1b8   :  { %v550_v22 = vpop.xlane.xlu1 %549 }
 0x1b9   :  { %v556_v23 = vpop.xlane.xlu2 %555  ;;  %571 = vst.msk [vmem:[%s1007_s5 + $0x8] sm:$0xff] %vm569_vm5, %v550_v22 }
 0x1ba   :  { %573 = vst.msk [vmem:[%s1007_s5 + $0x18] sm:$0xff] %vm569_vm5, %v556_v23 }
 0x1bd   :  { %v594_v24 = vpop.xlane.xlu0 %593 }
 0x1be   :  { %694 = vst.msk [vmem:[%s1007_s5 + $0x50] sm:$0xff] %vm569_vm5, %v594_v24 }
 0x1c0   :  { %v588_v26 = vpop.xlane.xlu1 %587 }
 0x1c1   :  { %692 = vst.msk [vmem:[%s1007_s5 + $0x40] sm:$0xff] %vm569_vm5, %v588_v26 }
 0x1c4   :  { %v591_v27 = vpop.xlane.xlu2 %590 }
 0x1c5   :  { %693 = vst.msk [vmem:[%s1007_s5 + $0x48] sm:$0xff] %vm569_vm5, %v591_v27  ;;  %v559_v29 = vpop.xlane.xlu0 %558 }
 0x1c6   :  { %574 = vst.msk [vmem:[%s1007_s5 + $0x20] sm:$0xff] %vm569_vm5, %v559_v29 }
 0x1c8   :  { %v597_v30 = vpop.xlane.xlu1 %596 }
 0x1c9   :  { %695 = vst.msk [vmem:[%s1007_s5 + $0x58] sm:$0xff] %vm569_vm5, %v597_v30 }
 0x1cc   :  { %v600_v31 = vpop.xlane.xlu2 %599 }
 0x1cd   :  { %696 = vst.msk [vmem:[%s1007_s5 + $0x60] sm:$0xff] %vm569_vm5, %v600_v31 }
 0x1d0   :  { %v562_v32 = vpop.xlane.xlu1 %561 }
 0x1d1   :  { %575 = vst.msk [vmem:[%s1007_s5 + $0x28] sm:$0xff] %vm569_vm5, %v562_v32 }
 0x1d4   :  { %v565_v33 = vpop.xlane.xlu2 %564 }
 0x1d5   :  { %576 = vst.msk [vmem:[%s1007_s5 + $0x30] sm:$0xff] %vm569_vm5, %v565_v33 }
 0x1d8   :  { %v568_v34 = vpop.xlane.xlu0 %567 }
 0x1d9   :  { %577 = vst.msk [vmem:[%s1007_s5 + $0x38] sm:$0xff] %vm569_vm5, %v568_v34 }
 0x1dc   :  { %v606_v25 = vpop.xlane.xlu1 %605 }
 0x1dd   :  { %698 = vst.msk [vmem:[%s1007_s5 + $0x70] sm:$0xff] %vm569_vm5, %v606_v25 }
 0x1e0   :  { %v603_v35 = vpop.xlane.xlu0 %602 }
 0x1e1   :  { %697 = vst.msk [vmem:[%s1007_s5 + $0x68] sm:$0xff] %vm569_vm5, %v603_v35 }
 0x1e4   :  { %v609_v36 = vpop.xlane.xlu2 %608 }
 0x1e5   :  { %699 = vst.msk [vmem:[%s1007_s5 + $0x78] sm:$0xff] %vm569_vm5, %v609_v36 }

</bundles_post_ra>
